<compile_context>
chip_gen: v6e
topology: v6e:2x2x1
jax: 0.10.0
libtpu: 0.0.40
codegen_flags: <defaults>
</compile_context>

<pallas_src>
import jax
import jax.numpy as jnp
from jax.experimental import pallas as pl
from jax.experimental.pallas import tpu as pltpu

CHAR_EMB = 50   # self.char_emb_size
KERNEL_K = 5    # standard a5 CNN kernel size


def _round_up(x, m):
    return (x + m - 1) // m * m


def _char_cnn_highway_kernel(x_ref, convw_ref, convb_ref, pgw_ref, pgb_ref,
                             out_ref):
    """Fused im2col-Conv1d + ReLU + max-pool + Highway for one tile of words.

    x_ref:     (n_pos, TILE_N, KC_pad)  bf16  im2col windows per conv position
    convw_ref: (KC_pad, E_pad)          bf16  flattened conv taps (zero padded)
    convb_ref: (1, E_pad)               f32
    pgw_ref:   (E_pad, 2*E_pad)         bf16  [proj_w | gate_w]
    pgb_ref:   (1, 2*E_pad)             f32   [proj_b | gate_b]
    out_ref:   (TILE_N, E_pad)          f32
    """
    n_pos, tile_n, kc = x_ref.shape
    e_pad = out_ref.shape[-1]

    # Conv1d over all valid positions as a single MXU matmul (K*C contraction).
    xf = x_ref[...].reshape(n_pos * tile_n, kc)                  # collapse leading dims
    y = jnp.dot(xf, convw_ref[...], preferred_element_type=jnp.float32)

    # Max-pool over time.  Bias-add + ReLU hoisted out of the loop:
    #   max_t ReLU(z_t + b) == ReLU(max_t z_t + b)   (ReLU monotone, b const in t)
    pooled = y[0:tile_n]
    for t in range(1, n_pos):                                    # static unroll
        pooled = jnp.maximum(pooled, y[t * tile_n:(t + 1) * tile_n])
    pooled = jnp.maximum(pooled + convb_ref[...], 0.0)           # (TILE_N, E_pad)

    # Highway: fused proj/gate matmul, then  out = x + g * (proj - x).
    pg = jnp.dot(pooled.astype(pgw_ref.dtype), pgw_ref[...],
                 preferred_element_type=jnp.float32) + pgb_ref[...]
    proj = jnp.maximum(pg[:, :e_pad], 0.0)
    gate = jax.nn.sigmoid(pg[:, e_pad:])
    out_ref[...] = pooled + gate * (proj - pooled)


def _prepare_weights(params, KC, KC_pad, E, E_pad):
    """Flatten / zero-pad / fuse weights once per call (tiny XLA glue)."""
    conv_w = jnp.zeros((KC_pad, E_pad), jnp.float32)
    conv_w = conv_w.at[:KC, :E].set(params["conv_w"].reshape(KC, E))
    conv_b = jnp.zeros((1, E_pad), jnp.float32).at[:, :E].set(params["conv_b"])

    proj_w = jnp.zeros((E_pad, E_pad), jnp.float32).at[:E, :E].set(params["proj_w"])
    gate_w = jnp.zeros((E_pad, E_pad), jnp.float32).at[:E, :E].set(params["gate_w"])
    pg_w = jnp.concatenate([proj_w, gate_w], axis=1)             # (E_pad, 2*E_pad)
    proj_b = jnp.zeros((1, E_pad), jnp.float32).at[:, :E].set(params["proj_b"])
    gate_b = jnp.zeros((1, E_pad), jnp.float32).at[:, :E].set(params["gate_b"])
    pg_b = jnp.concatenate([proj_b, gate_b], axis=1)             # (1, 2*E_pad)

    return (conv_w.astype(jnp.bfloat16), conv_b,
            pg_w.astype(jnp.bfloat16), pg_b)


def model_embeddings_forward(char_ids, params):
    """char_ids: (S, B, W) int32 indices into the char vocab -> (S, B, E) f32."""
    S, B, W = char_ids.shape
    K, C, E = params["conv_w"].shape
    assert W >= K, "max_word_length must be >= conv kernel size"
    N = S * B
    n_pos = W - K + 1

    KC = K * C
    KC_pad = _round_up(KC, 128)
    E_pad = _round_up(E, 128)
    TILE_N = min(512, _round_up(N, 16))        # multiple of 16 (bf16 sublanes)
    N_pad = _round_up(N, TILE_N)

    # --- XLA glue: embedding gather (padding row is zero -> padding_idx) + im2col.
    x = params["emb"][char_ids].reshape(N, W, C)                 # (N, W, C) f32
    x_col = jnp.stack(
        [x[:, t:t + K, :].reshape(N, KC) for t in range(n_pos)], axis=0)
    x_col = jnp.pad(x_col, ((0, 0), (0, N_pad - N), (0, KC_pad - KC)))
    x_col = x_col.astype(jnp.bfloat16)                           # (n_pos, N_pad, KC_pad)

    conv_w, conv_b, pg_w, pg_b = _prepare_weights(params, KC, KC_pad, E, E_pad)

    out = pl.pallas_call(
        _char_cnn_highway_kernel,
        out_shape=jax.ShapeDtypeStruct((N_pad, E_pad), jnp.float32),
        grid=(N_pad // TILE_N,),
        in_specs=[
            pl.BlockSpec((n_pos, TILE_N, KC_pad), lambda i: (0, i, 0)),
            pl.BlockSpec((KC_pad, E_pad), lambda i: (0, 0)),
            pl.BlockSpec((1, E_pad), lambda i: (0, 0)),
            pl.BlockSpec((E_pad, 2 * E_pad), lambda i: (0, 0)),
            pl.BlockSpec((1, 2 * E_pad), lambda i: (0, 0)),
        ],
        out_specs=pl.BlockSpec((TILE_N, E_pad), lambda i: (i, 0)),
        compiler_params=pltpu.CompilerParams(
            dimension_semantics=("parallel",),
            vmem_limit_bytes=32 * 1024 * 1024),
    )(x_col, conv_w, conv_b, pg_w, pg_b)

    # TODO(synk): Dropout(p=0.3) is inference-mode identity here (no in-kernel
    #             pltpu.prng_* masking for training).
    return out[:N, :E].reshape(S, B, E)


def init_params(key, vocab_size, embed_size, pad_idx=0):
    ks = jax.random.split(key, 6)
    emb = 0.1 * jax.random.normal(ks[0], (vocab_size, CHAR_EMB), jnp.float32)
    emb = emb.at[pad_idx].set(0.0)                      # padding_idx row = 0
    conv_w = 0.1 * jax.random.normal(ks[1], (KERNEL_K, CHAR_EMB, embed_size),
                                     jnp.float32)
    conv_b = 0.1 * jax.random.normal(ks[2], (1, embed_size), jnp.float32)
    proj_w = 0.1 * jax.random.normal(ks[3], (embed_size, embed_size), jnp.float32)
    proj_b = jnp.zeros((1, embed_size), jnp.float32)
    gate_w = 0.1 * jax.random.normal(ks[4], (embed_size, embed_size), jnp.float32)
    gate_b = 0.1 * jax.random.normal(ks[5], (1, embed_size), jnp.float32)
    return dict(emb=emb, conv_w=conv_w, conv_b=conv_b,
                proj_w=proj_w, proj_b=proj_b,
                gate_w=gate_w, gate_b=gate_b)


def reference_forward(char_ids, params):
    """Pure-JAX f32 reference of the PyTorch module forward (inference)."""
    S, B, W = char_ids.shape
    K, C, E = params["conv_w"].shape
    N = S * B
    x = params["emb"][char_ids].reshape(N, W, C)
    n_pos = W - K + 1
    w2d = params["conv_w"].reshape(K * C, E)
    z = jnp.stack([x[:, t:t + K, :].reshape(N, K * C) @ w2d
                   for t in range(n_pos)], axis=0)               # (n_pos, N, E)
    conv_out = jnp.max(jax.nn.relu(z + params["conv_b"]), axis=0)
    proj = jax.nn.relu(conv_out @ params["proj_w"] + params["proj_b"])
    gate = jax.nn.sigmoid(conv_out @ params["gate_w"] + params["gate_b"])
    hw = gate * proj + (1.0 - gate) * conv_out
    return hw.reshape(S, B, E)


if __name__ == "__main__":
    key = jax.random.PRNGKey(0)
    S, B, W = 8, 2, 16          # sentence_length, batch_size, max_word_length
    VOCAB, E, PAD = 30, 32, 0   # char vocab size, embed_size, pad idx

    k_ids, k_params = jax.random.split(key)
    char_ids = jax.random.randint(k_ids, (S, B, W), 0, VOCAB, dtype=jnp.int32)
    params = init_params(k_params, VOCAB, E, pad_idx=PAD)

    out = jax.block_until_ready(model_embeddings_forward(char_ids, params))
    ref = jax.block_until_ready(reference_forward(char_ids, params))

    assert out.shape == (S, B, E) and out.dtype == jnp.float32
    assert bool(jnp.all(jnp.isfinite(out)))
    # bf16 operands / f32 accumulation -> loose tolerance vs f32 reference.
    assert bool(jnp.allclose(out, ref, atol=3e-2, rtol=3e-2)), \
        float(jnp.max(jnp.abs(out - ref)))
    print("KERNEL_OK")
</pallas_src>

<mosaic_0001>
module attributes {stable_mosaic.version = 11 : i64} {
  func.func @_char_cnn_highway_kernel(%arg0: i32, %arg1: memref<12x16x256xbf16, #tpu.memory_space<vmem>>, %arg2: memref<256x128xbf16, #tpu.memory_space<vmem>>, %arg3: memref<1x128xf32, #tpu.memory_space<vmem>>, %arg4: memref<128x256xbf16, #tpu.memory_space<vmem>>, %arg5: memref<1x256xf32, #tpu.memory_space<vmem>>, %arg6: memref<16x128xf32, #tpu.memory_space<vmem>>) attributes {dimension_semantics = [#tpu.dimension_semantics<parallel>], iteration_bounds = array<i64: 1>, scalar_prefetch = 0 : i64, scratch_operands = 0 : i64, tpu.core_type = #tpu.core_type<tc>, window_params = [{transform_indices = @transform_0, window_bounds = array<i64: 12, 16, 256>}, {pipeline_mode = #tpu.pipeline_mode<synchronous>, transform_indices = @transform_1, window_bounds = array<i64: 256, 128>}, {pipeline_mode = #tpu.pipeline_mode<synchronous>, transform_indices = @transform_2, window_bounds = array<i64: 1, 128>}, {pipeline_mode = #tpu.pipeline_mode<synchronous>, transform_indices = @transform_3, window_bounds = array<i64: 128, 256>}, {pipeline_mode = #tpu.pipeline_mode<synchronous>, transform_indices = @transform_4, window_bounds = array<i64: 1, 256>}, {transform_indices = @transform_5, window_bounds = array<i64: 16, 128>}]} {
    %c0 = arith.constant 0 : index
    %c0_0 = arith.constant 0 : index
    %c0_1 = arith.constant 0 : index
    %0 = vector.load %arg1[%c0, %c0_0, %c0_1] : memref<12x16x256xbf16, #tpu.memory_space<vmem>>, vector<12x16x256xbf16>
    %1 = vector.shape_cast %0 : vector<12x16x256xbf16> to vector<192x256xbf16>
    %c0_2 = arith.constant 0 : index
    %c0_3 = arith.constant 0 : index
    %2 = vector.load %arg2[%c0_2, %c0_3] : memref<256x128xbf16, #tpu.memory_space<vmem>>, vector<256x128xbf16>
    %cst = arith.constant dense<0.000000e+00> : vector<192x128xf32>
    %3 = tpu.matmul %1, %2, %cst {dimension_numbers = #tpu.dot_dimension_numbers<[1], [0], [0], [1], [0, 0, 1, 1], [], []>} : vector<192x256xbf16>, vector<256x128xbf16>, vector<192x128xf32> -> vector<192x128xf32>
    %4 = vector.extract_strided_slice %3 {offsets = [0, 0], sizes = [16, 128], strides = [1, 1]} : vector<192x128xf32> to vector<16x128xf32>
    %5 = vector.extract_strided_slice %3 {offsets = [16, 0], sizes = [16, 128], strides = [1, 1]} : vector<192x128xf32> to vector<16x128xf32>
    %6 = arith.maximumf %4, %5 : vector<16x128xf32>
    %7 = vector.extract_strided_slice %3 {offsets = [32, 0], sizes = [16, 128], strides = [1, 1]} : vector<192x128xf32> to vector<16x128xf32>
    %8 = arith.maximumf %6, %7 : vector<16x128xf32>
    %9 = vector.extract_strided_slice %3 {offsets = [48, 0], sizes = [16, 128], strides = [1, 1]} : vector<192x128xf32> to vector<16x128xf32>
    %10 = arith.maximumf %8, %9 : vector<16x128xf32>
    %11 = vector.extract_strided_slice %3 {offsets = [64, 0], sizes = [16, 128], strides = [1, 1]} : vector<192x128xf32> to vector<16x128xf32>
    %12 = arith.maximumf %10, %11 : vector<16x128xf32>
    %13 = vector.extract_strided_slice %3 {offsets = [80, 0], sizes = [16, 128], strides = [1, 1]} : vector<192x128xf32> to vector<16x128xf32>
    %14 = arith.maximumf %12, %13 : vector<16x128xf32>
    %15 = vector.extract_strided_slice %3 {offsets = [96, 0], sizes = [16, 128], strides = [1, 1]} : vector<192x128xf32> to vector<16x128xf32>
    %16 = arith.maximumf %14, %15 : vector<16x128xf32>
    %17 = vector.extract_strided_slice %3 {offsets = [112, 0], sizes = [16, 128], strides = [1, 1]} : vector<192x128xf32> to vector<16x128xf32>
    %18 = arith.maximumf %16, %17 : vector<16x128xf32>
    %19 = vector.extract_strided_slice %3 {offsets = [128, 0], sizes = [16, 128], strides = [1, 1]} : vector<192x128xf32> to vector<16x128xf32>
    %20 = arith.maximumf %18, %19 : vector<16x128xf32>
    %21 = vector.extract_strided_slice %3 {offsets = [144, 0], sizes = [16, 128], strides = [1, 1]} : vector<192x128xf32> to vector<16x128xf32>
    %22 = arith.maximumf %20, %21 : vector<16x128xf32>
    %23 = vector.extract_strided_slice %3 {offsets = [160, 0], sizes = [16, 128], strides = [1, 1]} : vector<192x128xf32> to vector<16x128xf32>
    %24 = arith.maximumf %22, %23 : vector<16x128xf32>
    %25 = vector.extract_strided_slice %3 {offsets = [176, 0], sizes = [16, 128], strides = [1, 1]} : vector<192x128xf32> to vector<16x128xf32>
    %26 = arith.maximumf %24, %25 : vector<16x128xf32>
    %c0_4 = arith.constant 0 : index
    %c0_5 = arith.constant 0 : index
    %27 = vector.load %arg3[%c0_4, %c0_5] : memref<1x128xf32, #tpu.memory_space<vmem>>, vector<1x128xf32>
    %28 = vector.broadcast %27 : vector<1x128xf32> to vector<16x128xf32>
    %29 = arith.addf %26, %28 : vector<16x128xf32>
    %cst_6 = arith.constant 0.000000e+00 : f32
    %30 = vector.broadcast %cst_6 : f32 to vector<16x128xf32>
    %31 = arith.maximumf %29, %30 : vector<16x128xf32>
    %32 = arith.truncf %31 : vector<16x128xf32> to vector<16x128xbf16>
    %c0_7 = arith.constant 0 : index
    %c0_8 = arith.constant 0 : index
    %33 = vector.load %arg4[%c0_7, %c0_8] : memref<128x256xbf16, #tpu.memory_space<vmem>>, vector<128x256xbf16>
    %cst_9 = arith.constant dense<0.000000e+00> : vector<16x256xf32>
    %34 = tpu.matmul %32, %33, %cst_9 {dimension_numbers = #tpu.dot_dimension_numbers<[1], [0], [0], [1], [0, 0, 1, 1], [], []>} : vector<16x128xbf16>, vector<128x256xbf16>, vector<16x256xf32> -> vector<16x256xf32>
    %c0_10 = arith.constant 0 : index
    %c0_11 = arith.constant 0 : index
    %35 = vector.load %arg5[%c0_10, %c0_11] : memref<1x256xf32, #tpu.memory_space<vmem>>, vector<1x256xf32>
    %36 = vector.broadcast %35 : vector<1x256xf32> to vector<16x256xf32>
    %37 = arith.addf %34, %36 : vector<16x256xf32>
    %38 = vector.extract_strided_slice %37 {offsets = [0, 0], sizes = [16, 128], strides = [1, 1]} : vector<16x256xf32> to vector<16x128xf32>
    %cst_12 = arith.constant 0.000000e+00 : f32
    %39 = vector.broadcast %cst_12 : f32 to vector<16x128xf32>
    %40 = arith.maximumf %38, %39 : vector<16x128xf32>
    %41 = vector.extract_strided_slice %37 {offsets = [0, 128], sizes = [16, 128], strides = [1, 1]} : vector<16x256xf32> to vector<16x128xf32>
    %42 = arith.negf %41 : vector<16x128xf32>
    %43 = math.exp %42 : vector<16x128xf32>
    %cst_13 = arith.constant 1.000000e+00 : f32
    %44 = vector.broadcast %cst_13 : f32 to vector<16x128xf32>
    %45 = arith.addf %44, %43 : vector<16x128xf32>
    %46 = arith.divf %44, %45 : vector<16x128xf32>
    %47 = arith.subf %40, %31 : vector<16x128xf32>
    %48 = arith.mulf %46, %47 : vector<16x128xf32>
    %49 = arith.addf %31, %48 : vector<16x128xf32>
    %c0_14 = arith.constant 0 : index
    %c0_15 = arith.constant 0 : index
    %50 = vector.load %arg6[%c0_14, %c0_15] : memref<16x128xf32, #tpu.memory_space<vmem>>, vector<16x128xf32>
    tpu.vector_store %arg6[%c0_14, %c0_15], %49 {strides = array<i32>} : memref<16x128xf32, #tpu.memory_space<vmem>>, vector<16x128xf32>,
    return
  }
  func.func @transform_0(%arg0: i32) -> (i32, i32, i32) {
    %c0_i32 = arith.constant 0 : i32
    %c0_i32_0 = arith.constant 0 : i32
    %c0_i32_1 = arith.constant 0 : i32
    return %c0_i32, %arg0, %c0_i32_0 : i32, i32, i32
  }
  func.func @transform_1(%arg0: i32) -> (i32, i32) {
    %c0_i32 = arith.constant 0 : i32
    %c0_i32_0 = arith.constant 0 : i32
    %c0_i32_1 = arith.constant 0 : i32
    return %c0_i32, %c0_i32_0 : i32, i32
  }
  func.func @transform_2(%arg0: i32) -> (i32, i32) {
    %c0_i32 = arith.constant 0 : i32
    %c0_i32_0 = arith.constant 0 : i32
    %c0_i32_1 = arith.constant 0 : i32
    return %c0_i32, %c0_i32_0 : i32, i32
  }
  func.func @transform_3(%arg0: i32) -> (i32, i32) {
    %c0_i32 = arith.constant 0 : i32
    %c0_i32_0 = arith.constant 0 : i32
    %c0_i32_1 = arith.constant 0 : i32
    return %c0_i32, %c0_i32_0 : i32, i32
  }
  func.func @transform_4(%arg0: i32) -> (i32, i32) {
    %c0_i32 = arith.constant 0 : i32
    %c0_i32_0 = arith.constant 0 : i32
    %c0_i32_1 = arith.constant 0 : i32
    return %c0_i32, %c0_i32_0 : i32, i32
  }
  func.func @transform_5(%arg0: i32) -> (i32, i32) {
    %c0_i32 = arith.constant 0 : i32
    %c0_i32_0 = arith.constant 0 : i32
    return %arg0, %c0_i32 : i32, i32
  }
}

</mosaic_0001>

<bundles_post_ra>
// kernel: tpu_custom_call.1
= control target key start
LH: loop header
LB: loop body
LE: loop exit
PB: predicated region body
PF: predicated region fallthrough
CT: control target
= control target key end

     0   :  { %10 = vsyncpa [#allocation3], 0  ;;  %s1112_s0 = inlined_call_operand.hbm [shape: bf16[12,16,256], index: 0, kind: input, shape index: {}]   ;;  %s1113_s1 = inlined_call_operand.hbm [shape: bf16[256,128], index: 1, kind: input, shape index: {}]   ;;  %s1114_s2 = inlined_call_operand.vmem [shape: f32[1,128], index: 2, kind: input, shape index: {}]   ;;  %s1115_s3 = inlined_call_operand.hbm [shape: bf16[128,256], index: 3, kind: input, shape index: {}]   ;;  %s1116_s4 = inlined_call_operand.vmem [shape: f32[1,256], index: 4, kind: input, shape index: {}]   ;;  %s1117_s5 = inlined_call_operand.hbm [shape: f32[16,128], index: 5, kind: output, shape index: {}]  }
   0x1   :  { %11 = vsyncpa [#allocation6], 0 }
   0x2   :  { %12 = vsyncpa [#allocation4], 0  ;;  %s1031_s18 = smov [#allocation5]  }
   0x3   :  { %s30_s19 = sshll.u32 %s1031_s18, 4  ;;  %s31_s19 = int_to_ptr.vmem [resolvable:$true] %s30_s19 }
   0x4   :  { %s953_s20 = scalar_lea.vmem %s31_s19, 2048  ;;  %p958_p1 = scmp.lt.s32.totalorder %s31_s19, %s31_s19 }
   0x5   :  { %p954_p0 = scmp.ne.s32.totalorder %s31_s19, %s953_s20  ;;  %p959_p2 = scmp.lt.s32.totalorder %s953_s20, %s953_s20 }
   0x7   :  { %p960_p3 = por %p959_p2, %p958_p1 }
   0x9   :  { %p961_p4 = pnand %p960_p3, %p954_p0 }
   0xb   :  { %964 = shalt.err (!%p961_p4)
}
   0xc   :  { %s1032_s21 = smov 64   ;;  %s1033_s22 = smov 4  }
   0xd   :  { %36 = dma.hbm_to_vmem [thread:$0]  %s1113_s1, 2048, %s31_s19, [#allocation6], %s1032_s21, %s1032_s21, %s1033_s22  }
   0xe   :  { %s1034_s25 = smov [#allocation2]  }
   0xf   :  { %s18_s26 = sshll.u32 %s1034_s25, 4  ;;  %s19_s26 = int_to_ptr.vmem [resolvable:$true] %s18_s26 }
  0x10   :  { %s973_s27 = scalar_lea.vmem %s19_s26, 3072  ;;  %p978_p6 = scmp.lt.s32.totalorder %s19_s26, %s19_s26 }
  0x11   :  { %p974_p5 = scmp.ne.s32.totalorder %s19_s26, %s973_s27  ;;  %p979_p7 = scmp.lt.s32.totalorder %s973_s27, %s973_s27 }
  0x13   :  { %p980_p8 = por %p979_p7, %p978_p6 }
  0x15   :  { %p981_p9 = pnand %p980_p8, %p974_p5 }
  0x17   :  { %984 = shalt.err (!%p981_p9)
}
  0x18   :  { %s1035_s28 = smov 128   ;;  %s1036_s29 = smov 8  }
  0x19   :  { %24 = dma.hbm_to_vmem [thread:$0]  %s1112_s0, 3072, %s19_s26, [#allocation3], %s1035_s28, %s1035_s28, %s1036_s29  }
  0x1a   :  { %s1037_s1 = smov [#allocation7]  }
  0x1b   :  { %s44_s7 = sshll.u32 %s1037_s1, 4  ;;  %s45_s7 = int_to_ptr.vmem [resolvable:$true] %s44_s7 }
  0x1c   :  { %s993_s8 = scalar_lea.vmem %s45_s7, 2048  ;;  %p998_p11 = scmp.lt.s32.totalorder %s45_s7, %s45_s7 }
  0x1d   :  { %p994_p10 = scmp.ne.s32.totalorder %s45_s7, %s993_s8  ;;  %p999_p12 = scmp.lt.s32.totalorder %s993_s8, %s993_s8 }
  0x1f   :  { %p1000_p13 = por %p999_p12, %p998_p11 }
  0x21   :  { %p1001_p0 = pnand %p1000_p13, %p994_p10 }
  0x23   :  { %1004 = shalt.err (!%p1001_p0)
}
  0x24   :  { %50 = dma.hbm_to_vmem [thread:$0]  %s1115_s3, 2048, %s45_s7, [#allocation6], %s1035_s28, %s1035_s28, %s1036_s29  }
  0x25   :  { %1025 = dma.done.wait [#allocation3], 3072  }
  0x26   :  { %1026 = vsyncadd [#allocation3], 4294964224 }
  0x27   :  { %1027 = dma.done.wait [#allocation6], 4096  }
  0x28   :  { %1028 = vsyncadd [#allocation6], 4294963200  ;;  %v861_v0 = vld [vmem:[#allocation5 + $0x78] sm:$0xff]   ;;  %v863_v2 = vld [vmem:[#allocation5 + $0x70] sm:$0xff]   ;;  %v1038_v56 = vmov 0  }
  0x29   :  { %v862_v1 = vld [vmem:[#allocation5 + $0x38] sm:$0xff]   ;;  %748 = vmatprep.subr.bf16.mxu0 %v861_v0  ;;  %836 = vmatprep.subr.bf16.mxu1 %v861_v0  ;;  %v864_v3 = vld [vmem:[#allocation5 + $0x30] sm:$0xff]   ;;  %v865_v4 = vld [vmem:[#allocation5 + $0x68] sm:$0xff]  }
  0x2a   :  { %749 = vmatpush3.bf16.msra.mxu0 %v862_v1  ;;  %844 = vmatpush3.bf16.msra.mxu1 %v862_v1  ;;  %v866_v5 = vld [vmem:[#allocation5 + $0x28] sm:$0xff]   ;;  %v867_v6 = vld [vmem:[#allocation5 + $0x60] sm:$0xff]   ;;  %v869_v8 = vld [vmem:[#allocation5 + $0x58] sm:$0xff]  }
  0x2b   :  { %750 = vmatprep.subr.bf16.mxu0 %v863_v2  ;;  %837 = vmatprep.subr.bf16.mxu1 %v863_v2  ;;  %v868_v7 = vld [vmem:[#allocation5 + $0x20] sm:$0xff]   ;;  %v870_v9 = vld [vmem:[#allocation5 + $0x18] sm:$0xff]   ;;  %v871_v10 = vld [vmem:[#allocation5 + $0x50] sm:$0xff]  }
  0x2c   :  { %v879_v11 = vld [vmem:[#allocation2 + $0x4] ss:$8 sps:$4 sm:$0xff]   ;;  %v872_v12 = vld [vmem:[#allocation5 + $0x10] sm:$0xff]   ;;  %v877_v18 = vld [vmem:[#allocation2] ss:$8 sps:$4 sm:$0xff]  }
  0x2d   :  { %367 = vmatprep.mubr.bf16.mxu0 %v879_v11  ;;  %v873_v13 = vld [vmem:[#allocation5 + $0x48] sm:$0xff]   ;;  %v888_v14 = vld [vmem:[#allocation2 + $0x74] ss:$8 sps:$4 sm:$0xff]   ;;  %v875_v16 = vld [vmem:[#allocation5 + $0x40] sm:$0xff]  }
  0x2e   :  { %751 = vmatpush3.bf16.msra.mxu0 %v864_v3  ;;  %845 = vmatpush3.bf16.msra.mxu1 %v864_v3  ;;  %v874_v15 = vld [vmem:[#allocation5 + $0x8] sm:$0xff]   ;;  %v876_v17 = vld [vmem:[#allocation5] sm:$0xff]   ;;  %v880_v19 = vld [vmem:[#allocation2 + $0x14] ss:$8 sps:$4 sm:$0xff]  }
  0x2f   :  { %752 = vmatprep.subr.bf16.mxu0 %v865_v4  ;;  %838 = vmatprep.subr.bf16.mxu1 %v865_v4  ;;  %v886_v20 = vld [vmem:[#allocation2 + $0x70] ss:$8 sps:$4 sm:$0xff]   ;;  %v892_v21 = vld [vmem:[#allocation2 + $0x84] ss:$8 sps:$4 sm:$0xff]   ;;  %v894_v24 = vld [vmem:[#allocation2 + $0x80] ss:$8 sps:$4 sm:$0xff]  }
  0x30   :  { %423 = vmatprep.mubr.bf16.mxu1 %v888_v14  ;;  %v882_v22 = vld [vmem:[#allocation2 + $0x10] ss:$8 sps:$4 sm:$0xff]   ;;  %v883_v23 = vld [vmem:[#allocation2 + $0x24] ss:$8 sps:$4 sm:$0xff]   ;;  %v898_v25 = vld [vmem:[#allocation2 + $0x94] ss:$8 sps:$4 sm:$0xff]  }
  0x31   :  { %v885_v26 = vld [vmem:[#allocation2 + $0x20] ss:$8 sps:$4 sm:$0xff]   ;;  %v889_v27 = vld [vmem:[#allocation2 + $0x34] ss:$8 sps:$4 sm:$0xff]   ;;  %v900_v28 = vld [vmem:[#allocation2 + $0x90] ss:$8 sps:$4 sm:$0xff]  }
  0x32   :  { %753 = vmatpush3.bf16.msra.mxu0 %v866_v5  ;;  %846 = vmatpush3.bf16.msra.mxu1 %v866_v5  ;;  %v904_v29 = vld [vmem:[#allocation2 + $0xa4] ss:$8 sps:$4 sm:$0xff]   ;;  %v891_v30 = vld [vmem:[#allocation2 + $0x30] ss:$8 sps:$4 sm:$0xff]   ;;  %v906_v32 = vld [vmem:[#allocation2 + $0xa0] ss:$8 sps:$4 sm:$0xff]  }
  0x33   :  { %754 = vmatprep.subr.bf16.mxu0 %v867_v6  ;;  %839 = vmatprep.subr.bf16.mxu1 %v867_v6  ;;  %v895_v31 = vld [vmem:[#allocation2 + $0x44] ss:$8 sps:$4 sm:$0xff]   ;;  %v910_v33 = vld [vmem:[#allocation2 + $0xb4] ss:$8 sps:$4 sm:$0xff]   ;;  %v897_v34 = vld [vmem:[#allocation2 + $0x40] ss:$8 sps:$4 sm:$0xff]  }
  0x34   :  { %v901_v35 = vld [vmem:[#allocation2 + $0x54] ss:$8 sps:$4 sm:$0xff]   ;;  %v912_v36 = vld [vmem:[#allocation2 + $0xb0] ss:$8 sps:$4 sm:$0xff]   ;;  %v907_v38 = vld [vmem:[#allocation2 + $0x64] ss:$8 sps:$4 sm:$0xff]  }
  0x35   :  { %v903_v37 = vld [vmem:[#allocation2 + $0x50] ss:$8 sps:$4 sm:$0xff]   ;;  %v909_v39 = vld [vmem:[#allocation2 + $0x60] ss:$8 sps:$4 sm:$0xff]   ;;  %v915_v41 = vld [vmem:[#allocation7 + $0x74] ss:$8 sps:$4 sm:$0xff]  }
  0x36   :  { %755 = vmatpush3.bf16.msra.mxu0 %v868_v7  ;;  %847 = vmatpush3.bf16.msra.mxu1 %v868_v7  ;;  %v913_v40 = vld [vmem:[#allocation7 + $0x70] ss:$8 sps:$4 sm:$0xff]   ;;  %v916_v42 = vld [vmem:[#allocation7 + $0x60] ss:$8 sps:$4 sm:$0xff]   ;;  %v918_v43 = vld [vmem:[#allocation7 + $0x64] ss:$8 sps:$4 sm:$0xff]  }
  0x37   :  { %756 = vmatprep.subr.bf16.mxu0 %v869_v8  ;;  %840 = vmatprep.subr.bf16.mxu1 %v869_v8  ;;  %v919_v44 = vld [vmem:[#allocation7 + $0x50] ss:$8 sps:$4 sm:$0xff]   ;;  %v921_v45 = vld [vmem:[#allocation7 + $0x54] ss:$8 sps:$4 sm:$0xff]   ;;  %v922_v46 = vld [vmem:[#allocation7 + $0x40] ss:$8 sps:$4 sm:$0xff]  }
  0x38   :  { %v924_v47 = vld [vmem:[#allocation7 + $0x44] ss:$8 sps:$4 sm:$0xff]   ;;  %v927_v48 = vld [vmem:[#allocation7 + $0x34] ss:$8 sps:$4 sm:$0xff]   ;;  %v925_v49 = vld [vmem:[#allocation7 + $0x30] ss:$8 sps:$4 sm:$0xff]  }
  0x39   :  { %v930_v50 = vld [vmem:[#allocation7 + $0x24] ss:$8 sps:$4 sm:$0xff]   ;;  %v928_v51 = vld [vmem:[#allocation7 + $0x20] ss:$8 sps:$4 sm:$0xff]   ;;  %v933_v52 = vld [vmem:[#allocation7 + $0x14] ss:$8 sps:$4 sm:$0xff]  }
  0x3a   :  { %757 = vmatpush3.bf16.msra.mxu0 %v870_v9  ;;  %848 = vmatpush3.bf16.msra.mxu1 %v870_v9  ;;  %v931_v53 = vld [vmem:[#allocation7 + $0x10] ss:$8 sps:$4 sm:$0xff]   ;;  %v936_v54 = vld [vmem:[#allocation7 + $0x4] ss:$8 sps:$4 sm:$0xff]   ;;  %v934_v55 = vld [vmem:[#allocation7] ss:$8 sps:$4 sm:$0xff]  }
  0x3b   :  { %758 = vmatprep.subr.bf16.mxu0 %v871_v10  ;;  %841 = vmatprep.subr.bf16.mxu1 %v871_v10 }
  0x3e   :  { %759 = vmatpush3.bf16.msra.mxu0 %v872_v12  ;;  %849 = vmatpush3.bf16.msra.mxu1 %v872_v12 }
  0x3f   :  { %760 = vmatprep.subr.bf16.mxu0 %v873_v13  ;;  %842 = vmatprep.subr.bf16.mxu1 %v873_v13 }
  0x42   :  { %761 = vmatpush3.bf16.msra.mxu0 %v874_v15  ;;  %850 = vmatpush3.bf16.msra.mxu1 %v874_v15 }
  0x43   :  { %762 = vmatprep.subr.bf16.mxu0 %v875_v16  ;;  %843 = vmatprep.subr.bf16.mxu1 %v875_v16 }
  0x46   :  { %763 = vmatpush3.bf16.msra.mxu0 %v876_v17  ;;  %851 = vmatpush3.bf16.msra.mxu1 %v876_v17 }
  0x47   :  { %606 = vmatprep.subr.bf16.mxu1 %v915_v41 }
  0x49   :  { %368 = vmatmul.mubr.bf16.vlgmr.msra.gmra.mxu0 %v877_v18  ;;  %424 = vmatmul.mubr.bf16.vlgmr.msra.gmra.mxu1 %v886_v20 }
  0x4a   :  { %375 = vmatprep.mubr.bf16.mxu0 %v880_v19  ;;  %431 = vmatprep.mubr.bf16.mxu1 %v892_v21 }
  0x4b   :  { %607 = vmatpush1.bf16.msra.mxu1 %v913_v40 }
  0x4c   :  { %608 = vmatprep.subr.bf16.mxu1 %v918_v43 }
  0x4f   :  { %609 = vmatpush1.bf16.msra.mxu1 %v916_v42 }
  0x50   :  { %610 = vmatprep.subr.bf16.mxu1 %v921_v45 }
  0x51   :  { %376 = vmatmul.mubr.bf16.gmra.mxu0 %v882_v22  ;;  %432 = vmatmul.mubr.bf16.gmra.mxu1 %v894_v24 }
  0x52   :  { %383 = vmatprep.mubr.bf16.mxu0 %v883_v23  ;;  %439 = vmatprep.mubr.bf16.mxu1 %v898_v25 }
  0x53   :  { %611 = vmatpush1.bf16.msra.mxu1 %v919_v44 }
  0x54   :  { %612 = vmatprep.subr.bf16.mxu1 %v924_v47 }
  0x57   :  { %613 = vmatpush1.bf16.msra.mxu1 %v922_v46 }
  0x58   :  { %614 = vmatprep.subr.bf16.mxu1 %v927_v48 }
  0x59   :  { %384 = vmatmul.mubr.bf16.gmra.mxu0 %v885_v26  ;;  %440 = vmatmul.mubr.bf16.gmra.mxu1 %v900_v28 }
  0x5a   :  { %391 = vmatprep.mubr.bf16.mxu0 %v889_v27  ;;  %447 = vmatprep.mubr.bf16.mxu1 %v904_v29 }
  0x5b   :  { %615 = vmatpush1.bf16.msra.mxu1 %v925_v49 }
  0x5c   :  { %616 = vmatprep.subr.bf16.mxu1 %v930_v50 }
  0x5f   :  { %617 = vmatpush1.bf16.msra.mxu1 %v928_v51 }
  0x60   :  { %618 = vmatprep.subr.bf16.mxu1 %v933_v52 }
  0x61   :  { %392 = vmatmul.mubr.bf16.gmra.mxu0 %v891_v30  ;;  %448 = vmatmul.mubr.bf16.gmra.mxu1 %v906_v32 }
  0x62   :  { %399 = vmatprep.mubr.bf16.mxu0 %v895_v31  ;;  %455 = vmatprep.mubr.bf16.mxu1 %v910_v33 }
  0x63   :  { %619 = vmatpush1.bf16.msra.mxu1 %v931_v53 }
  0x64   :  { %620 = vmatprep.subr.bf16.mxu1 %v936_v54 }
  0x67   :  { %621 = vmatpush1.bf16.msra.mxu1 %v934_v55 }
  0x69   :  { %400 = vmatmul.mubr.bf16.gmra.mxu0 %v897_v34  ;;  %456 = vmatmul.mubr.bf16.gmra.mxu1 %v912_v36 }
  0x6a   :  { %407 = vmatprep.mubr.bf16.mxu0 %v901_v35  ;;  %638 = vmatprep.mubr.bf16.mxu1 %v1038_v56 }
  0x71   :  { %408 = vmatmul.mubr.bf16.gmra.mxu0 %v903_v37 }
  0x72   :  { %415 = vmatprep.mubr.bf16.mxu0 %v907_v38 }
  0x79   :  { %416 = vmatmul.mubr.bf16.gmra.mxu0 %v909_v39 }
 0x109   :  { %v764_v57 = vpop.f32.mrf.mxu0  ;;  %v1085_v58 = vpop.f32.mrf.mxu1 }
 0x10b   :  { %v765_v59 = vpop.f32.mrf.mxu0  ;;  %v807_v60 = vpop.f32.mrf.mxu1 }
 0x10c   :  { %v766_v29 = vadd.f32 %v765_v59, %v764_v57  ;;  %v808_v59 = vadd.f32 %v807_v60, %v1085_v58 }
 0x10d   :  { %v767_v61 = vpop.f32.mrf.mxu0  ;;  %v1087_v62 = vpop.f32.mrf.mxu1 }
 0x10f   :  { %v768_v63 = vpop.f32.mrf.mxu0  ;;  %v1089_v0 = vpop.f32.mrf.mxu1 }
 0x110   :  { %v769_v37 = vadd.f32 %v768_v63, %v767_v61 }
 0x111   :  { %v770_v1 = vpop.f32.mrf.mxu0  ;;  %v812_v2 = vpop.f32.mrf.mxu1 }
 0x113   :  { %v771_v3 = vpop.f32.mrf.mxu0  ;;  %v813_v4 = vpop.f32.mrf.mxu1 }
 0x114   :  { %v772_v27 = vadd.f32 %v771_v3, %v770_v1 }
 0x115   :  { %v773_v5 = vpop.f32.mrf.mxu0  ;;  %v1091_v6 = vpop.f32.mrf.mxu1 }
 0x116   :  { %v464_v33 = vmax.f32 %v766_v29, %v772_v27 }
 0x117   :  { %v774_v7 = vpop.f32.mrf.mxu0  ;;  %v1093_v8 = vpop.f32.mrf.mxu1 }
 0x118   :  { %v775_v34 = vadd.f32 %v774_v7, %v773_v5  ;;  %v814_v5 = vadd.f32 %v813_v4, %v812_v2 }
 0x119   :  { %v776_v9 = vpop.f32.mrf.mxu0  ;;  %v818_v11 = vpop.f32.mrf.mxu1 }
 0x11a   :  { %v465_v43 = vmax.f32 %v769_v37, %v775_v34 }
 0x11b   :  { %v777_v10 = vpop.f32.mrf.mxu0  ;;  %v819_v14 = vpop.f32.mrf.mxu1 }
 0x11c   :  { %v778_v30 = vadd.f32 %v777_v10, %v776_v9 }
 0x11d   :  { %v779_v12 = vpop.f32.mrf.mxu0  ;;  %v821_v17 = vpop.f32.mrf.mxu1 }
 0x11e   :  { %v466_v38 = vmax.f32 %v464_v33, %v778_v30 }
 0x11f   :  { %v780_v13 = vpop.f32.mrf.mxu0  ;;  %v822_v20 = vpop.f32.mrf.mxu1 }
 0x120   :  { %v781_v39 = vadd.f32 %v780_v13, %v779_v12  ;;  %v811_v12 = vadd.f32 %v1089_v0, %v1087_v62  ;;  %v820_v13 = vadd.f32 %v819_v14, %v818_v11  ;;  %v729_v62 = vld [vmem:[%s1114_s2] ss:$0 sm:$0xff]  ;;  %s1039_s2 = smov [#allocation8]  }
 0x121   :  { %v782_v15 = vpop.f32.mrf.mxu0  ;;  %v824_v23 = vpop.f32.mrf.mxu1 }
 0x122   :  { %v467_v48 = vmax.f32 %v465_v43, %v781_v39 }
 0x123   :  { %v783_v16 = vpop.f32.mrf.mxu0  ;;  %v825_v26 = vpop.f32.mrf.mxu1 }
 0x124   :  { %v784_v35 = vadd.f32 %v783_v16, %v782_v15 }
 0x125   :  { %v785_v18 = vpop.f32.mrf.mxu0  ;;  %v827_v32 = vpop.f32.mrf.mxu1 }
 0x126   :  { %v468_v44 = vmax.f32 %v466_v38, %v784_v35 }
 0x127   :  { %v786_v19 = vpop.f32.mrf.mxu0  ;;  %v828_v42 = vpop.f32.mrf.mxu1 }
 0x128   :  { %v787_v45 = vadd.f32 %v786_v19, %v785_v18  ;;  %v817_v19 = vadd.f32 %v1093_v8, %v1091_v6  ;;  %v829_v27 = vadd.f32 %v828_v42, %v827_v32  ;;  %v514_v32 = vld [vmem:[%s1116_s4] sm:$0x3]  ;;  %s676_s4 = sshll.u32 %s1039_s2, 4  ;;  %s677_s4 = int_to_ptr.vmem [resolvable:$true] %s676_s4 }
 0x129   :  { %v788_v21 = vpop.f32.mrf.mxu0  ;;  %v830_v52 = vpop.f32.mrf.mxu1  ;;  %s1005_s13 = scalar_lea.vmem %s677_s4, 256  ;;  %p1010_p2 = scmp.lt.s32.totalorder %s677_s4, %s677_s4 }
 0x12a   :  { %v469_v53 = vmax.f32 %v467_v48, %v787_v45  ;;  %p1006_p1 = scmp.ne.s32.totalorder %s677_s4, %s1005_s13  ;;  %p1011_p3 = scmp.lt.s32.totalorder %s1005_s13, %s1005_s13 }
 0x12b   :  { %v789_v22 = vpop.f32.mrf.mxu0  ;;  %v831_v3 = vpop.f32.mrf.mxu1 }
 0x12c   :  { %v790_v40 = vadd.f32 %v789_v22, %v788_v21  ;;  %v826_v21 = vadd.f32 %v825_v26, %v824_v23  ;;  %v823_v22 = vadd.f32 %v822_v20, %v821_v17  ;;  %v516_v17 = vlaneseq  ;;  %p1012_p4 = por %p1011_p3, %p1010_p2 }
 0x12d   :  { %v791_v24 = vpop.f32.mrf.mxu0  ;;  %v833_v18 = vpop.f32.mrf.mxu1 }
 0x12e   :  { %v470_v49 = vmax.f32 %v468_v44, %v790_v40  ;;  %v517_v20 = vshrl.u32 %v516_v17, 7  ;;  %p1013_p5 = pnand %p1012_p4, %p1006_p1 }
 0x12f   :  { %v792_v25 = vpop.f32.mrf.mxu0  ;;  %v834_v4 = vpop.f32.mrf.mxu1 }
 0x130   :  { %v793_v50 = vadd.f32 %v792_v25, %v791_v24  ;;  %v832_v25 = vadd.f32 %v831_v3, %v830_v52  ;;  %v835_v0 = vadd.f32 %v834_v4, %v833_v18  ;;  %v518_v42 = vsub.s32 0, %v517_v20 }
 0x131   :  { %v794_v28 = vpop.f32.mrf.mxu0 }
 0x132   :  { %v471_v61 = vmax.f32 %v469_v53, %v793_v50  ;;  %v519_v45 = vrot.slane %v514_v32, %v518_v42 }
 0x133   :  { %v795_v31 = vpop.f32.mrf.mxu0 }
 0x134   :  { %v796_v46 = vadd.f32 %v795_v31, %v794_v28  ;;  %v522_v31 = vsub.s32 1, %v517_v20 }
 0x135   :  { %v797_v36 = vpop.f32.mrf.mxu0 }
 0x136   :  { %v472_v54 = vmax.f32 %v470_v49, %v796_v46  ;;  %v523_v33 = vrot.slane %v514_v32, %v522_v31 }
 0x137   :  { %v798_v41 = vpop.f32.mrf.mxu0 }
 0x138   :  { %v799_v55 = vadd.f32 %v798_v41, %v797_v36 }
 0x139   :  { %v800_v47 = vpop.f32.mrf.mxu0 }
 0x13a   :  { %v473_v7 = vmax.f32 %v471_v61, %v799_v55 }
 0x13b   :  { %v801_v51 = vpop.f32.mrf.mxu0 }
 0x13c   :  { %v802_v56 = vadd.f32 %v801_v51, %v800_v47 }
 0x13d   :  { %v803_v57 = vpop.f32.mrf.mxu0 }
 0x13e   :  { %v474_v63 = vmax.f32 %v472_v54, %v802_v56 }
 0x13f   :  { %v804_v1 = vpop.f32.mrf.mxu0 }
 0x140   :  { %v476_v9 = vmax.f32 %v474_v63, %v808_v59  ;;  %v805_v10 = vadd.f32 %v804_v1, %v803_v57 }
 0x142   :  { %v478_v15 = vmax.f32 %v476_v9, %v814_v5  ;;  %v475_v16 = vmax.f32 %v473_v7, %v805_v10 }
 0x144   :  { %v477_v58 = vmax.f32 %v475_v16, %v811_v12  ;;  %v480_v60 = vmax.f32 %v478_v15, %v820_v13 }
 0x146   :  { %v479_v24 = vmax.f32 %v477_v58, %v817_v19  ;;  %v482_v2 = vmax.f32 %v480_v60, %v826_v21 }
 0x148   :  { %v484_v28 = vmax.f32 %v482_v2, %v832_v25  ;;  %v481_v29 = vmax.f32 %v479_v24, %v823_v22 }
 0x14a   :  { %v483_v11 = vmax.f32 %v481_v29, %v829_v27  ;;  %v493_v14 = vadd.f32 %v729_v62, %v484_v28 }
 0x14c   :  { %v485_v30 = vmax.f32 %v483_v11, %v835_v0  ;;  %v495_v8 = vmax.f32 %v493_v14, 0.0 }
 0x14e   :  { %v494_v6 = vadd.f32 %v729_v62, %v485_v30 }
 0x150   :  { %v496_v23 = vmax.f32 %v494_v6, 0.0 }
 0x152   :  { %v497_v26 = vpack.c.bf16 %v496_v23, %v495_v8 }
 0x154   :  { %639 = vmatmul.mubr.bf16.vlgmr.msra.gmra.mxu1 %v497_v26 }
 0x214   :  { %v640_v34 = vpop.f32.mrf.mxu1 }
 0x215   :  { %v641_v48 = vadd.f32 %v640_v34, %v519_v45 }
 0x216   :  { %v642_v35 = vpop.f32.mrf.mxu1 }
 0x217   :  { %v643_v36 = vadd.f32 %v642_v35, %v523_v33  ;;  %v649_v49 = vmax.f32 %v641_v48, 0.0 }
 0x218   :  { %v644_v37 = vpop.f32.mrf.mxu1 }
 0x219   :  { %v746_v38 = vmul.f32 -1.442695, %v643_v36  ;;  %v645_v50 = vadd.f32 %v644_v37, %v519_v45  ;;  %v663_v51 = vsub.f32 %v649_v49, %v495_v8 }
 0x21a   :  { %v646_v39 = vpop.f32.mrf.mxu1 }
 0x21b   :  { %937 = vpow2.f32 %v746_v38  ;;  %v647_v40 = vadd.f32 %v646_v39, %v523_v33  ;;  %v650_v52 = vmax.f32 %v645_v50, 0.0 }
 0x21d   :  { %v747_v41 = vmul.f32 -1.442695, %v647_v40  ;;  %v664_v55 = vsub.f32 %v650_v52, %v496_v23 }
 0x21f   :  { %939 = vpow2.f32 %v747_v41 }
 0x228   :  { %v938_v43 = vpop.eup %937 }
 0x229   :  { %v657_v44 = vadd.f32 1.0, %v938_v43 }
 0x22b   :  { %941 = vrcp.f32 %v657_v44 }
 0x22c   :  { %v940_v46 = vpop.eup %939 }
 0x22d   :  { %v658_v47 = vadd.f32 1.0, %v940_v46 }
 0x22f   :  { %943 = vrcp.f32 %v658_v47 }
 0x238   :  { %v942_v53 = vpop.eup %941 }
 0x239   :  { %v665_v54 = vmul.f32 %v942_v53, %v663_v51 }
 0x23b   :  { %v667_v56 = vadd.f32 %v665_v54, %v495_v8 }
 0x23c   :  { %v944_v57 = vpop.eup %943 }
 0x23d   :  { %v666_v59 = vmul.f32 %v944_v57, %v664_v55  ;;  %669 = vst [vmem:[#allocation8] sm:$0xff] %v667_v56 }
 0x23f   :  { %v668_v61 = vadd.f32 %v666_v59, %v496_v23 }
 0x241   :  { %670 = vst [vmem:[#allocation8 + $0x8] sm:$0xff] %v668_v61 }
 0x242   :  { %1016 = shalt.err (!%p1013_p5)
}
 0x243   :  { %682 = dma.vmem_to_hbm [thread:$0]  %s677_s4, 256, %s1117_s5, [#allocation4], %s1035_s28, %s1035_s28, %s1036_s29  }
 0x244   :  { %1029 = dma.done.wait [#allocation4], 256  }
 0x245   :  { %1030 = vsyncadd [#allocation4], 4294967040 }
 0x246   :  { %686 = vsyncpa [#allocation3], 1 }
 0x247   :  { %687 = vsyncpa [#allocation6], 1 }
 0x248   :  { %688 = vsyncpa [#allocation4], 1 }

</bundles_post_ra>
